<compile_context>
chip_gen: v5e
topology: v5e:2x2
jax: 0.10.0
libtpu: 0.0.40
codegen_flags: <defaults>
</compile_context>

<pallas_src>
import jax
import jax.numpy as jnp
from jax.experimental import pallas as pl
from jax.experimental.pallas import tpu as pltpu


# ----------------------------------------------------------------------------
# Small-input path: single full-extent VMEM block copy (always layout-legal).
# ----------------------------------------------------------------------------
def _vmem_copy_kernel(x_ref, o_ref):
    o_ref[...] = x_ref[...]


def _single_block_copy(img: jax.Array) -> jax.Array:
    return pl.pallas_call(
        _vmem_copy_kernel,
        out_shape=jax.ShapeDtypeStruct(img.shape, img.dtype),
    )(img)


# ----------------------------------------------------------------------------
# Large-input path: chunked HBM->HBM DMA (no VMEM staging, no vld/vst).
# ----------------------------------------------------------------------------
def _make_hbm_copy_kernel(chunk_rows: int, num_full: int, tail_rows: int,
                          nbuf: int):
    prime = min(nbuf, num_full)

    def kernel(x_hbm, o_hbm, sems):
        def chunk_copy(start, nrows, slot):
            return pltpu.make_async_copy(
                x_hbm.at[pl.ds(start, nrows), :],
                o_hbm.at[pl.ds(start, nrows), :],
                sems.at[slot],
            )

        # Prime up to `prime` outstanding HBM->HBM DMAs (static unroll).
        for c in range(prime):
            chunk_copy(c * chunk_rows, chunk_rows, c).start()

        # Rolling window: wait on chunk c, immediately re-issue chunk c+prime
        # on the same semaphore slot (at most `prime` DMAs in flight).
        @pl.loop(0, num_full)
        def _(c):
            slot = c % nbuf
            chunk_copy(c * chunk_rows, chunk_rows, slot).wait()

            @pl.when(c + prime < num_full)
            def _():
                chunk_copy((c + prime) * chunk_rows, chunk_rows, slot).start()

        # Static ragged tail chunk, issued after the window has drained.
        if tail_rows > 0:
            tail = chunk_copy(num_full * chunk_rows, tail_rows, 0)
            tail.start()
            tail.wait()

    return kernel


def pallas_identity_copy(img: jax.Array, *, chunk_bytes: int = 4 << 20,
                         nbuf: int = 4, small_bytes: int = 1 << 20,
                         lane: int = 512) -> jax.Array:
    """EmptyTransform.forward as a materialized Pallas copy.

    Small tensors: single full-extent VMEM block copy.
    Large tensors: chunked HBM->HBM DMA with a rolling window of outstanding
    async copies (saturates HBM bandwidth; no VMEM round trip)."""
    orig_shape = img.shape
    total = int(img.size)
    itemsize = jnp.dtype(img.dtype).itemsize
    nbytes = total * itemsize

    if total == 0:
        return img
    if nbytes <= small_bytes:
        return _single_block_copy(img)

    # Lane-dense 2D slab; pad so the chunked path always applies (no
    # whole-array fallback block that could blow past VMEM / DMA limits).
    sub = 8 * max(1, 4 // itemsize)            # packed sublane count for dtype
    unit = lane * sub
    padded_total = -(-total // unit) * unit
    flat = img.reshape(-1)
    if padded_total != total:
        flat = jnp.pad(flat, (0, padded_total - total))
    rows = padded_total // lane                # multiple of `sub`
    slab = flat.reshape(rows, lane)

    # ~chunk_bytes per DMA, sublane-aligned chunk starts; static ragged tail.
    target_rows = max(sub, (chunk_bytes // (lane * itemsize)) // sub * sub)
    chunk_rows = min(rows, target_rows)
    num_full = rows // chunk_rows
    tail_rows = rows - num_full * chunk_rows

    out = pl.pallas_call(
        _make_hbm_copy_kernel(chunk_rows, num_full, tail_rows, nbuf),
        out_shape=jax.ShapeDtypeStruct((rows, lane), slab.dtype),
        in_specs=[pl.BlockSpec(memory_space=pl.ANY)],
        out_specs=pl.BlockSpec(memory_space=pl.ANY),
        scratch_shapes=[pltpu.SemaphoreType.DMA((nbuf,))],
        compiler_params=pltpu.CompilerParams(has_side_effects=True),
        cost_estimate=pl.CostEstimate(
            flops=0, transcendentals=0,
            bytes_accessed=2 * padded_total * itemsize),
    )(slab)

    out_flat = out.reshape(-1)
    if padded_total != total:
        out_flat = out_flat[:total]
    return out_flat.reshape(orig_shape)


# ----------------------------------------------------------------------------
# JAX-side module equivalents (host-side glue only; no parameters).
# ----------------------------------------------------------------------------
class EmptyTransform:
    """Identity transform.

    Default (materialize=False): returns inputs unchanged — no kernel launch,
    zero HBM traffic — exactly matching the PyTorch module.
    materialize=True: routes the image through the Pallas copy kernel."""

    def __init__(self, materialize: bool = False):
        self.materialize = materialize

    def __call__(self, *inputs):
        if not self.materialize:
            return inputs if len(inputs) > 1 else inputs[0]
        if len(inputs) > 1:
            img, *rest = inputs
            return (pallas_identity_copy(img), *rest)
        return pallas_identity_copy(inputs[0])


class Compose:
    """Mirror of the PyTorch Compose: chains transforms over (img, target)."""

    # TODO(synk): dict-based transform construction via GLOBAL_CONFIG registry
    # is host-side Python config plumbing and has no Pallas equivalent.
    def __init__(self, ops=None, materialize: bool = False):
        transforms = []
        if ops is not None:
            for op in ops:
                if callable(op):
                    transforms.append(op)
                else:
                    raise ValueError(f"Invalid transform spec: {op}")
        else:
            # Same default as the PyTorch module: ops=None -> [EmptyTransform()]
            transforms = [EmptyTransform(materialize=materialize)]
        self.transforms = transforms

    def __call__(self, img, target=None):
        for t in self.transforms:
            if target is not None:
                img, target = t(img, target)
            else:
                img, target = t(img), None
        return (img, target) if target is not None else img


# ----------------------------------------------------------------------------
# Demo / self-test
# ----------------------------------------------------------------------------
if __name__ == "__main__":
    key = jax.random.PRNGKey(0)
    img = jax.random.normal(key, (2, 4, 16, 16), dtype=jnp.float32)

    # 1) Small input: single full-extent VMEM block Pallas copy.
    out = jax.block_until_ready(pallas_identity_copy(img))
    assert out.shape == img.shape and out.dtype == img.dtype
    assert jnp.array_equal(out, img)

    # 2) Chunked HBM->HBM DMA path, forced with tiny thresholds so padding,
    #    the rolling DMA window (5 full chunks > 4 slots) and the ragged tail
    #    are all exercised at a small shape.
    img2 = jax.random.normal(jax.random.PRNGKey(1), (2, 4, 55, 100),
                             dtype=jnp.float32)
    out2 = jax.block_until_ready(
        pallas_identity_copy(img2, chunk_bytes=16 * 512 * 4, small_bytes=0))
    assert out2.shape == img2.shape and out2.dtype == img2.dtype
    assert jnp.array_equal(out2, img2)

    # 3) Compose(ops=None): fast path -> true identity, no kernel launched.
    compose = Compose(ops=None)
    assert compose(img) is img  # exact pass-through, zero HBM traffic
    target = {"boxes": jnp.ones((3, 4), jnp.float32),
              "labels": jnp.zeros((3,), jnp.int32)}
    o_img, o_tgt = compose(img, target)
    assert o_img is img and o_tgt is target

    # 4) Compose with a materializing EmptyTransform routes through the kernel.
    compose_mat = Compose(ops=None, materialize=True)
    out3 = jax.block_until_ready(compose_mat(img))
    assert jnp.array_equal(out3, img)

    print("KERNEL_OK")
</pallas_src>

<mosaic_0001>
module attributes {stable_mosaic.version = 11 : i64} {
  func.func @_vmem_copy_kernel(%arg0: memref<2x4x16x16xf32, #tpu.memory_space<vmem>>, %arg1: memref<2x4x16x16xf32, #tpu.memory_space<vmem>>) attributes {dimension_semantics = [], scalar_prefetch = 0 : i64, scratch_operands = 0 : i64, tpu.core_type = #tpu.core_type<tc>} {
    %c0 = arith.constant 0 : index
    %c0_0 = arith.constant 0 : index
    %c0_1 = arith.constant 0 : index
    %c0_2 = arith.constant 0 : index
    %0 = vector.load %arg0[%c0, %c0_0, %c0_1, %c0_2] : memref<2x4x16x16xf32, #tpu.memory_space<vmem>>, vector<2x4x16x16xf32>
    %c0_3 = arith.constant 0 : index
    %c0_4 = arith.constant 0 : index
    %c0_5 = arith.constant 0 : index
    %c0_6 = arith.constant 0 : index
    %1 = vector.load %arg1[%c0_3, %c0_4, %c0_5, %c0_6] : memref<2x4x16x16xf32, #tpu.memory_space<vmem>>, vector<2x4x16x16xf32>
    tpu.vector_store %arg1[%c0_3, %c0_4, %c0_5, %c0_6], %0 {strides = array<i32>} : memref<2x4x16x16xf32, #tpu.memory_space<vmem>>, vector<2x4x16x16xf32>,
    return
  }
}

</mosaic_0001>

<bundles_post_ra>
// kernel: tpu_custom_call.1
= control target key start
LH: loop header
LB: loop body
LE: loop exit
PB: predicated region body
PF: predicated region fallthrough
CT: control target
= control target key end

     0   :  { %6 = vsyncpa [#allocation3], 0  ;;  %s175_s0 = inlined_call_operand.hbm [shape: f32[2,4,16,16], index: 0, kind: input, shape index: {}]   ;;  %s176_s1 = inlined_call_operand.hbm [shape: f32[2,4,16,16], index: 1, kind: output, shape index: {}]  }
   0x1   :  { %7 = vsyncpa [#allocation4], 0  ;;  %s12_s8 = sshll.u32 %s175_s0, 4  ;;  %s133_s9 = smov [#allocation2]   ;;  %s13_s8 = int_to_ptr.hbm [resolvable:$true] %s12_s8 }
   0x2   :  { %s14_s10 = sshll.u32 %s133_s9, 4  ;;  %s134_s11 = smov 128   ;;  %s15_s10 = int_to_ptr.vmem [resolvable:$true] %s14_s10 }
   0x3   :  { %s135_s12 = smov 8  }
   0x4   :  { %20 = dma.hbm_to_vmem [thread:$0]  %s13_s8, 2048, %s15_s10, [#allocation3], %s134_s11, %s134_s11, %s135_s12  }
   0x5   :  { %129 = dma.done.wait [#allocation3], 2048  }
   0x6   :  { %130 = vsyncadd [#allocation3], 4294965248  ;;  %vm41_vm0 = vcmask 130048   ;;  %v25_v0 = vld [vmem:[#allocation2] sm:$0xff]  ;;  %v26_v1 = vld [vmem:[#allocation2 + $0x8] sm:$0xff]  ;;  %s136_s0 = smov [#allocation5]  }
   0x7   :  { %v27_v2 = vld [vmem:[#allocation2 + $0x10] sm:$0xff]  ;;  %42 = vst.msk [vmem:[#allocation5] sm:$0xff] %vm41_vm0, %v25_v0  ;;  %v28_v3 = vld [vmem:[#allocation2 + $0x18] sm:$0xff]  ;;  %v29_v4 = vld [vmem:[#allocation2 + $0x20] sm:$0xff]  ;;  %s62_s13 = sshll.u32 %s136_s0, 4  ;;  %s64_s16 = sshll.u32 %s176_s1, 4  ;;  %s63_s13 = int_to_ptr.vmem [resolvable:$true] %s62_s13  ;;  %s65_s16 = int_to_ptr.hbm [resolvable:$true] %s64_s16 }
   0x8   :  { %43 = vst.msk [vmem:[#allocation5 + $0x8] sm:$0xff] %vm41_vm0, %v26_v1  ;;  %v30_v5 = vld [vmem:[#allocation2 + $0x28] sm:$0xff]  ;;  %v31_v6 = vld [vmem:[#allocation2 + $0x30] sm:$0xff]  ;;  %v32_v7 = vld [vmem:[#allocation2 + $0x38] sm:$0xff] }
   0x9   :  { %44 = vst.msk [vmem:[#allocation5 + $0x10] sm:$0xff] %vm41_vm0, %v27_v2  ;;  %v33_v8 = vld [vmem:[#allocation2 + $0x40] sm:$0xff]  ;;  %v34_v9 = vld [vmem:[#allocation2 + $0x48] sm:$0xff]  ;;  %v35_v10 = vld [vmem:[#allocation2 + $0x50] sm:$0xff] }
   0xa   :  { %45 = vst.msk [vmem:[#allocation5 + $0x18] sm:$0xff] %vm41_vm0, %v28_v3  ;;  %v36_v11 = vld [vmem:[#allocation2 + $0x58] sm:$0xff]  ;;  %v37_v12 = vld [vmem:[#allocation2 + $0x60] sm:$0xff]  ;;  %v38_v13 = vld [vmem:[#allocation2 + $0x68] sm:$0xff] }
   0xb   :  { %46 = vst.msk [vmem:[#allocation5 + $0x20] sm:$0xff] %vm41_vm0, %v29_v4  ;;  %v39_v14 = vld [vmem:[#allocation2 + $0x70] sm:$0xff]  ;;  %v40_v15 = vld [vmem:[#allocation2 + $0x78] sm:$0xff] }
   0xc   :  { %47 = vst.msk [vmem:[#allocation5 + $0x28] sm:$0xff] %vm41_vm0, %v30_v5 }
   0xd   :  { %48 = vst.msk [vmem:[#allocation5 + $0x30] sm:$0xff] %vm41_vm0, %v31_v6 }
   0xe   :  { %49 = vst.msk [vmem:[#allocation5 + $0x38] sm:$0xff] %vm41_vm0, %v32_v7 }
   0xf   :  { %50 = vst.msk [vmem:[#allocation5 + $0x40] sm:$0xff] %vm41_vm0, %v33_v8 }
  0x10   :  { %51 = vst.msk [vmem:[#allocation5 + $0x48] sm:$0xff] %vm41_vm0, %v34_v9 }
  0x11   :  { %52 = vst.msk [vmem:[#allocation5 + $0x50] sm:$0xff] %vm41_vm0, %v35_v10 }
  0x12   :  { %53 = vst.msk [vmem:[#allocation5 + $0x58] sm:$0xff] %vm41_vm0, %v36_v11 }
  0x13   :  { %54 = vst.msk [vmem:[#allocation5 + $0x60] sm:$0xff] %vm41_vm0, %v37_v12 }
  0x14   :  { %55 = vst.msk [vmem:[#allocation5 + $0x68] sm:$0xff] %vm41_vm0, %v38_v13 }
  0x15   :  { %56 = vst.msk [vmem:[#allocation5 + $0x70] sm:$0xff] %vm41_vm0, %v39_v14 }
  0x16   :  { %57 = vst.msk [vmem:[#allocation5 + $0x78] sm:$0xff] %vm41_vm0, %v40_v15 }
  0x17   :  { %70 = dma.vmem_to_hbm [thread:$0]  %s63_s13, 2048, %s65_s16, [#allocation4], %s134_s11, %s134_s11, %s135_s12  }
  0x18   :  { %131 = dma.done.wait [#allocation4], 2048  }
  0x19   :  { %132 = vsyncadd [#allocation4], 4294965248 }
  0x1a   :  { %75 = vsyncpa [#allocation3], 1 }
  0x1b   :  { %76 = vsyncpa [#allocation4], 1 }

</bundles_post_ra>
